<compile_context>
chip_gen: v7x
topology: tpu7x:2x2x1
jax: 0.10.0
libtpu: 0.0.40
codegen_flags: <defaults>
</compile_context>

<pallas_src>
import math

import jax
import jax.numpy as jnp
from jax.experimental import pallas as pl
from jax.experimental.pallas import tpu as pltpu


def _round_up(a, b):
    return pl.cdiv(a, b) * b


def _vmem_estimate(block_n, d, block_c):
    """Rough per-core VMEM footprint (bytes) for one tile configuration."""
    return (2 * block_n * d * 4          # x tile, f32, double-buffered
            + 2 * d * block_c * 2        # W^T tile, bf16, double-buffered
            + 2 * block_n * 128 * 4      # labels (lane-padded), double-buffered
            + 2 * 8 * 128 * 4            # output tile
            + block_n * d * 2            # xb scratch (bf16)
            + 2 * block_n * 128 * 4      # sum_e / t scratch (lane-padded)
            + 4 * block_n * block_c * 4) # wf/e intermediates + headroom


def _make_kernel(*, loss_type, s, m, eps, block_n, block_c,
                 n_rows, n_classes, padded_classes):
    cos_m = math.cos(m)
    sin_m = math.sin(m)

    def kernel(x_ref, wt_ref, lbl_ref, out_ref, xb_ref, sume_ref, t_ref):
        i = pl.program_id(0)              # row tile
        j = pl.program_id(1)              # class tile (innermost, "arbitrary")
        nj = pl.num_programs(1)

        # ---- per-row-tile init: normalize rows once, cache bf16 copy, zero accs
        @pl.when(j == 0)
        def _init():
            x = x_ref[...].astype(jnp.float32)                       # (bn, D)
            sq = jnp.sum(x * x, axis=-1, keepdims=True)
            inv = jax.lax.rsqrt(jnp.maximum(sq, jnp.float32(1e-24)))  # EUP, no divide
            xb_ref[...] = (x * inv).astype(jnp.bfloat16)
            sume_ref[...] = jnp.zeros_like(sume_ref)
            t_ref[...] = jnp.zeros_like(t_ref)

        # ---- bf16 MXU matmul against this class tile, f32 accumulate
        wf = jnp.dot(xb_ref[...], wt_ref[...],
                     preferred_element_type=jnp.float32)             # (bn, bc) f32

        lbl = lbl_ref[...]                                           # (bn, 1) int32
        col = j * block_c + jax.lax.broadcasted_iota(
            jnp.int32, (block_n, block_c), 1)
        tgt_mask = col == lbl

        e = jnp.exp(s * wf)
        if padded_classes:
            e = jnp.where(col < n_classes, e, 0.0)                   # zero padded cols
        sume_ref[...] += jnp.sum(e, axis=-1, keepdims=True)
        t_ref[...] += jnp.sum(jnp.where(tgt_mask, wf, 0.0),
                              axis=-1, keepdims=True)

        # ---- finalize on the last class tile
        @pl.when(j == nj - 1)
        def _finalize():
            t = t_ref[...]                                           # (bn, 1)
            if loss_type == "cosface":
                numerator = s * (t - m)
            elif loss_type == "arcface":
                tc = jnp.clip(t, -1.0 + eps, 1.0 - eps)
                # s*cos(acos(t)+m) == s*(t*cos(m) - sqrt(1-t^2)*sin(m)); no acos on-chip
                numerator = s * (tc * cos_m
                                 - jnp.sqrt(jnp.maximum(1.0 - tc * tc, 0.0)) * sin_m)
            else:  # sphereface
                tc = jnp.clip(t, -1.0 + eps, 1.0 - eps)
                # TODO(synk): relies on arccos lowering inside Mosaic; untested here.
                numerator = s * jnp.cos(m * jnp.arccos(tc))

            # exclude target class by subtracting its exp from the running total
            excl = sume_ref[...] - jnp.exp(s * t)
            L = numerator - jnp.log(jnp.exp(numerator) + excl)       # (bn, 1)

            # zero padded batch rows, then reduce this tile to a single scalar
            row = i * block_n + jax.lax.broadcasted_iota(jnp.int32, (block_n, 1), 0)
            L = jnp.where(row < n_rows, L, 0.0)
            tile_sum = jnp.sum(L)

            r8 = jax.lax.broadcasted_iota(jnp.int32, (8, 128), 0)
            c8 = jax.lax.broadcasted_iota(jnp.int32, (8, 128), 1)
            out_ref[...] = jnp.where((r8 == 0) & (c8 == 0),
                                     tile_sum, 0.0).astype(jnp.float32)

    return kernel


def angular_penalty_sm_loss(x, weight, labels, *, loss_type="arcface", eps=1e-7,
                            s=None, m=None, block_n=512, block_c=None):
    """Pallas implementation of AngularPenaltySMLoss.forward.

    x:      (N, in_features) float
    weight: (out_features, in_features) float (nn.Linear weight, used unnormalized --
            faithful to the reference, where the weight-normalize loop is a no-op)
    labels: (N,) int in [0, out_features)
    """
    loss_type = loss_type.lower()
    assert loss_type in ("arcface", "sphereface", "cosface")
    defaults = {"arcface": (64.0, 0.5), "sphereface": (64.0, 1.35), "cosface": (30.0, 0.4)}
    s = defaults[loss_type][0] if s is None else float(s)
    m = defaults[loss_type][1] if m is None else float(m)

    x = jnp.asarray(x, jnp.float32)
    n, d = x.shape
    c, d2 = weight.shape
    assert d == d2 and labels.shape == (n,)

    # --- class tiling: lane-dense (multiple of 128; 256-multiples are best on v6e/v7x)
    if block_c is None:
        block_c = min(_round_up(c, 128), 512)
    else:
        block_c = _round_up(int(block_c), 128)
    c_pad = _round_up(c, block_c)
    nc_tiles = c_pad // block_c

    # --- batch tiling: big tiles, shrunk until the VMEM footprint is modest
    block_n = max(8, min(_round_up(int(block_n), 8), _round_up(n, 8)))
    while block_n > 8 and _vmem_estimate(block_n, d, block_c) > (24 << 20):
        block_n = max(8, _round_up(block_n // 2, 8))
    n_pad = _round_up(n, block_n)
    nr_tiles = n_pad // block_n

    if n_pad != n:
        x = jnp.pad(x, ((0, n_pad - n), (0, 0)))
        labels = jnp.pad(labels, (0, n_pad - n))

    # NOTE: in a training loop, keep the classifier weight stored as (D, C) bf16 to
    # avoid this per-call transpose/cast (a full C*D HBM round trip).
    wt = jnp.transpose(weight).astype(jnp.bfloat16)                  # (D, C)
    if c_pad != c:
        wt = jnp.pad(wt, ((0, 0), (0, c_pad - c)))
    lbl2d = labels.astype(jnp.int32).reshape(n_pad, 1)

    kernel = _make_kernel(
        loss_type=loss_type, s=s, m=m, eps=float(eps),
        block_n=block_n, block_c=block_c, n_rows=n, n_classes=c,
        padded_classes=(c_pad != c))

    est = _vmem_estimate(block_n, d, block_c)
    vmem_limit = int(min(max(est * 3 // 2 + (2 << 20), 16 << 20), 40 << 20))

    partials = pl.pallas_call(
        kernel,
        out_shape=jax.ShapeDtypeStruct((nr_tiles * 8, 128), jnp.float32),
        grid=(nr_tiles, nc_tiles),
        in_specs=[
            pl.BlockSpec((block_n, d), lambda i, j: (i, 0)),    # x rows (constant over j)
            pl.BlockSpec((d, block_c), lambda i, j: (0, j)),    # W^T class tile (bf16)
            pl.BlockSpec((block_n, 1), lambda i, j: (i, 0)),    # labels per row tile
        ],
        out_specs=pl.BlockSpec((8, 128), lambda i, j: (i, 0)),  # tiny per-tile partial
        scratch_shapes=[
            pltpu.VMEM((block_n, d), jnp.bfloat16),             # cached normalized rows
            pltpu.VMEM((block_n, 1), jnp.float32),              # running sum of exp
            pltpu.VMEM((block_n, 1), jnp.float32),              # running target logit
        ],
        compiler_params=pltpu.CompilerParams(
            # row tiles write disjoint outputs -> safe to shard across TensorCores
            dimension_semantics=("parallel", "arbitrary"),
            vmem_limit_bytes=vmem_limit,
        ),
    )(x, wt, lbl2d)

    # tiny final reduction + mean in plain JAX (padded rows / lanes contribute 0)
    return -(jnp.sum(partials) / jnp.float32(n))


def _reference(x, weight, labels, *, loss_type="arcface", eps=1e-7, s=None, m=None,
               matmul_dtype=jnp.float32):
    """Pure-JAX mirror of the PyTorch forward (weight-normalize loop is a no-op)."""
    loss_type = loss_type.lower()
    defaults = {"arcface": (64.0, 0.5), "sphereface": (64.0, 1.35), "cosface": (30.0, 0.4)}
    s = defaults[loss_type][0] if s is None else float(s)
    m = defaults[loss_type][1] if m is None else float(m)

    n = x.shape[0]
    c = weight.shape[0]
    inv = jax.lax.rsqrt(jnp.maximum(jnp.sum(x * x, axis=1, keepdims=True), 1e-24))
    xn = x * inv
    wf = jnp.dot(xn.astype(matmul_dtype), weight.T.astype(matmul_dtype),
                 preferred_element_type=jnp.float32,
                 precision=jax.lax.Precision.HIGHEST).astype(jnp.float32)
    t = wf[jnp.arange(n), labels]
    if loss_type == "cosface":
        numerator = s * (t - m)
    elif loss_type == "arcface":
        numerator = s * jnp.cos(jnp.arccos(jnp.clip(t, -1.0 + eps, 1.0 - eps)) + m)
    else:
        numerator = s * jnp.cos(m * jnp.arccos(jnp.clip(t, -1.0 + eps, 1.0 - eps)))
    mask = labels[:, None] == jnp.arange(c)[None, :]
    excl = jnp.sum(jnp.where(mask, 0.0, jnp.exp(s * wf)), axis=1)
    L = numerator - jnp.log(jnp.exp(numerator) + excl)
    return -jnp.mean(L)


if __name__ == "__main__":
    key = jax.random.PRNGKey(0)
    kx, kw1, kl1, kw2, kl2 = jax.random.split(key, 5)

    N, D = 16, 64
    x = jax.random.normal(kx, (N, D), dtype=jnp.float32)

    # Case 1: small class count (C=32 -> one padded 128-wide class tile).
    C1 = 32
    W1 = jax.random.normal(kw1, (C1, D), dtype=jnp.float32)
    W1 = W1 / jnp.linalg.norm(W1, axis=1, keepdims=True)   # keep s*logits exp-safe
    y1 = jax.random.randint(kl1, (N,), 0, C1, dtype=jnp.int32)

    # Case 2: multiple class tiles (C=160, block_c=128 -> 2 class tiles) and
    # multiple row tiles (block_n=8 -> 2 row tiles) to exercise both grid axes.
    C2 = 160
    W2 = jax.random.normal(kw2, (C2, D), dtype=jnp.float32)
    W2 = W2 / jnp.linalg.norm(W2, axis=1, keepdims=True)
    y2 = jax.random.randint(kl2, (N,), 0, C2, dtype=jnp.int32)

    cases = [
        ("arcface", W1, y1, {}),
        ("cosface", W1, y1, {}),
        ("arcface", W2, y2, {"block_n": 8, "block_c": 128}),
    ]
    for lt, W, y, opts in cases:
        loss = jax.block_until_ready(
            angular_penalty_sm_loss(x, W, y, loss_type=lt, **opts))
        # Tight check vs. a bf16-matmul mirror (same MXU precision as the kernel).
        ref_bf16 = _reference(x, W, y, loss_type=lt, matmul_dtype=jnp.bfloat16)
        # Loose check vs. the faithful f32 reference (bf16 rounding amplified by s).
        ref_f32 = _reference(x, W, y, loss_type=lt, matmul_dtype=jnp.float32)
        assert jnp.allclose(loss, ref_bf16, atol=2e-3, rtol=1e-3), \
            (lt, float(loss), float(ref_bf16))
        assert jnp.allclose(loss, ref_f32, atol=5e-2, rtol=5e-3), \
            (lt, float(loss), float(ref_f32))

    print("KERNEL_OK")
</pallas_src>

<mosaic_0001>
module attributes {stable_mosaic.version = 11 : i64} {
  func.func @kernel(%arg0: i32, %arg1: i32, %arg2: memref<16x64xf32, #tpu.memory_space<vmem>>, %arg3: memref<64x128xbf16, #tpu.memory_space<vmem>>, %arg4: memref<16x1xi32, #tpu.memory_space<vmem>>, %arg5: memref<8x128xf32, #tpu.memory_space<vmem>>, %arg6: memref<16x64xbf16, #tpu.memory_space<vmem>>, %arg7: memref<16x1xf32, #tpu.memory_space<vmem>>, %arg8: memref<16x1xf32, #tpu.memory_space<vmem>>) attributes {dimension_semantics = [#tpu.dimension_semantics<parallel>, #tpu.dimension_semantics<arbitrary>], iteration_bounds = array<i64: 1, 1>, scalar_prefetch = 0 : i64, scratch_operands = 3 : i64, tpu.core_type = #tpu.core_type<tc>, window_params = [{transform_indices = @transform_0, window_bounds = array<i64: 16, 64>}, {transform_indices = @transform_1, window_bounds = array<i64: 64, 128>}, {transform_indices = @transform_2, window_bounds = array<i64: 16, 1>}, {transform_indices = @transform_3, window_bounds = array<i64: 8, 128>}]} {
    %c0_i32 = arith.constant 0 : i32
    %0 = arith.cmpi eq, %arg1, %c0_i32 : i32
    %1 = arith.extui %0 : i1 to i32
    %c0_i32_0 = arith.constant 0 : i32
    %2 = arith.cmpi ne, %1, %c0_i32_0 : i32
    scf.if %2 {
      %c0_21 = arith.constant 0 : index
      %c0_22 = arith.constant 0 : index
      %35 = vector.load %arg2[%c0_21, %c0_22] : memref<16x64xf32, #tpu.memory_space<vmem>>, vector<16x64xf32>
      %36 = arith.mulf %35, %35 : vector<16x64xf32>
      %cst_23 = arith.constant dense<0.000000e+00> : vector<16xf32>
      %37 = vector.multi_reduction <add>, %36, %cst_23 [1] : vector<16x64xf32> to vector<16xf32>
      %38 = vector.shape_cast %37 : vector<16xf32> to vector<16x1xf32>
      %cst_24 = arith.constant 1.000000e-24 : f32
      %39 = vector.broadcast %cst_24 : f32 to vector<16x1xf32>
      %40 = arith.maximumf %38, %39 : vector<16x1xf32>
      %41 = math.rsqrt %40 : vector<16x1xf32>
      %42 = vector.broadcast %41 : vector<16x1xf32> to vector<16x64xf32>
      %43 = arith.mulf %35, %42 : vector<16x64xf32>
      %44 = arith.truncf %43 : vector<16x64xf32> to vector<16x64xbf16>
      %c0_25 = arith.constant 0 : index
      %c0_26 = arith.constant 0 : index
      %45 = vector.load %arg6[%c0_25, %c0_26] : memref<16x64xbf16, #tpu.memory_space<vmem>>, vector<16x64xbf16>
      tpu.vector_store %arg6[%c0_25, %c0_26], %44 {strides = array<i32>} : memref<16x64xbf16, #tpu.memory_space<vmem>>, vector<16x64xbf16>,
      %cst_27 = arith.constant 0.000000e+00 : f32
      %46 = vector.broadcast %cst_27 : f32 to vector<16x1xf32>
      %c0_28 = arith.constant 0 : index
      %c0_29 = arith.constant 0 : index
      %47 = vector.load %arg7[%c0_28, %c0_29] : memref<16x1xf32, #tpu.memory_space<vmem>>, vector<16x1xf32>
      tpu.vector_store %arg7[%c0_28, %c0_29], %46 {strides = array<i32>} : memref<16x1xf32, #tpu.memory_space<vmem>>, vector<16x1xf32>,
      %cst_30 = arith.constant 0.000000e+00 : f32
      %48 = vector.broadcast %cst_30 : f32 to vector<16x1xf32>
      %c0_31 = arith.constant 0 : index
      %c0_32 = arith.constant 0 : index
      %49 = vector.load %arg8[%c0_31, %c0_32] : memref<16x1xf32, #tpu.memory_space<vmem>>, vector<16x1xf32>
      tpu.vector_store %arg8[%c0_31, %c0_32], %48 {strides = array<i32>} : memref<16x1xf32, #tpu.memory_space<vmem>>, vector<16x1xf32>,
    } else {
    }
    %c0 = arith.constant 0 : index
    %c0_1 = arith.constant 0 : index
    %3 = vector.load %arg6[%c0, %c0_1] : memref<16x64xbf16, #tpu.memory_space<vmem>>, vector<16x64xbf16>
    %c0_2 = arith.constant 0 : index
    %c0_3 = arith.constant 0 : index
    %4 = vector.load %arg3[%c0_2, %c0_3] : memref<64x128xbf16, #tpu.memory_space<vmem>>, vector<64x128xbf16>
    %cst = arith.constant dense<0.000000e+00> : vector<16x128xf32>
    %5 = tpu.matmul %3, %4, %cst {dimension_numbers = #tpu.dot_dimension_numbers<[1], [0], [0], [1], [0, 0, 1, 1], [], []>} : vector<16x64xbf16>, vector<64x128xbf16>, vector<16x128xf32> -> vector<16x128xf32>
    %c0_4 = arith.constant 0 : index
    %c0_5 = arith.constant 0 : index
    %6 = vector.load %arg4[%c0_4, %c0_5] : memref<16x1xi32, #tpu.memory_space<vmem>>, vector<16x1xi32>
    %c128_i32 = arith.constant 128 : i32
    %7 = arith.muli %arg1, %c128_i32 : i32
    %8 = tpu.iota {dimensions = array<i32: 1>} : vector<16x128xi32>
    %9 = vector.broadcast %7 : i32 to vector<16x128xi32>
    %10 = arith.addi %9, %8 : vector<16x128xi32>
    %11 = vector.broadcast %6 : vector<16x1xi32> to vector<16x128xi32>
    %12 = arith.cmpi eq, %10, %11 : vector<16x128xi32>
    %cst_6 = arith.constant 6.400000e+01 : f32
    %13 = vector.broadcast %cst_6 : f32 to vector<16x128xf32>
    %14 = arith.mulf %13, %5 : vector<16x128xf32>
    %15 = math.exp %14 : vector<16x128xf32>
    %c32_i32 = arith.constant 32 : i32
    %16 = vector.broadcast %c32_i32 : i32 to vector<16x128xi32>
    %17 = arith.cmpi slt, %10, %16 : vector<16x128xi32>
    %cst_7 = arith.constant 0.000000e+00 : f32
    %18 = vector.broadcast %cst_7 : f32 to vector<16x128xf32>
    %19 = arith.select %17, %15, %18 : vector<16x128xi1>, vector<16x128xf32>
    %c0_8 = arith.constant 0 : index
    %c0_9 = arith.constant 0 : index
    %20 = vector.load %arg7[%c0_8, %c0_9] : memref<16x1xf32, #tpu.memory_space<vmem>>, vector<16x1xf32>
    %cst_10 = arith.constant dense<0.000000e+00> : vector<16xf32>
    %21 = vector.multi_reduction <add>, %19, %cst_10 [1] : vector<16x128xf32> to vector<16xf32>
    %22 = vector.shape_cast %21 : vector<16xf32> to vector<16x1xf32>
    %23 = arith.addf %20, %22 : vector<16x1xf32>
    %c0_11 = arith.constant 0 : index
    %c0_12 = arith.constant 0 : index
    %24 = vector.load %arg7[%c0_11, %c0_12] : memref<16x1xf32, #tpu.memory_space<vmem>>, vector<16x1xf32>
    tpu.vector_store %arg7[%c0_11, %c0_12], %23 {strides = array<i32>} : memref<16x1xf32, #tpu.memory_space<vmem>>, vector<16x1xf32>,
    %c0_13 = arith.constant 0 : index
    %c0_14 = arith.constant 0 : index
    %25 = vector.load %arg8[%c0_13, %c0_14] : memref<16x1xf32, #tpu.memory_space<vmem>>, vector<16x1xf32>
    %cst_15 = arith.constant 0.000000e+00 : f32
    %26 = vector.broadcast %cst_15 : f32 to vector<16x128xf32>
    %27 = arith.select %12, %5, %26 : vector<16x128xi1>, vector<16x128xf32>
    %cst_16 = arith.constant dense<0.000000e+00> : vector<16xf32>
    %28 = vector.multi_reduction <add>, %27, %cst_16 [1] : vector<16x128xf32> to vector<16xf32>
    %29 = vector.shape_cast %28 : vector<16xf32> to vector<16x1xf32>
    %30 = arith.addf %25, %29 : vector<16x1xf32>
    %c0_17 = arith.constant 0 : index
    %c0_18 = arith.constant 0 : index
    %31 = vector.load %arg8[%c0_17, %c0_18] : memref<16x1xf32, #tpu.memory_space<vmem>>, vector<16x1xf32>
    tpu.vector_store %arg8[%c0_17, %c0_18], %30 {strides = array<i32>} : memref<16x1xf32, #tpu.memory_space<vmem>>, vector<16x1xf32>,
    %c0_i32_19 = arith.constant 0 : i32
    %32 = arith.cmpi eq, %arg1, %c0_i32_19 : i32
    %33 = arith.extui %32 : i1 to i32
    %c0_i32_20 = arith.constant 0 : i32
    %34 = arith.cmpi ne, %33, %c0_i32_20 : i32
    scf.if %34 {
      %c0_21 = arith.constant 0 : index
      %c0_22 = arith.constant 0 : index
      %35 = vector.load %arg8[%c0_21, %c0_22] : memref<16x1xf32, #tpu.memory_space<vmem>>, vector<16x1xf32>
      %cst_23 = arith.constant -0.99999988 : f32
      %cst_24 = arith.constant 0.99999988 : f32
      %36 = vector.broadcast %cst_23 : f32 to vector<16x1xf32>
      %37 = arith.maximumf %36, %35 : vector<16x1xf32>
      %38 = vector.broadcast %cst_24 : f32 to vector<16x1xf32>
      %39 = arith.minimumf %38, %37 : vector<16x1xf32>
      %cst_25 = arith.constant 0.87758255 : f32
      %40 = vector.broadcast %cst_25 : f32 to vector<16x1xf32>
      %41 = arith.mulf %39, %40 : vector<16x1xf32>
      %42 = arith.mulf %39, %39 : vector<16x1xf32>
      %cst_26 = arith.constant 1.000000e+00 : f32
      %43 = vector.broadcast %cst_26 : f32 to vector<16x1xf32>
      %44 = arith.subf %43, %42 : vector<16x1xf32>
      %cst_27 = arith.constant 0.000000e+00 : f32
      %45 = vector.broadcast %cst_27 : f32 to vector<16x1xf32>
      %46 = arith.maximumf %44, %45 : vector<16x1xf32>
      %47 = math.sqrt %46 : vector<16x1xf32>
      %cst_28 = arith.constant 0.47942555 : f32
      %48 = vector.broadcast %cst_28 : f32 to vector<16x1xf32>
      %49 = arith.mulf %47, %48 : vector<16x1xf32>
      %50 = arith.subf %41, %49 : vector<16x1xf32>
      %cst_29 = arith.constant 6.400000e+01 : f32
      %51 = vector.broadcast %cst_29 : f32 to vector<16x1xf32>
      %52 = arith.mulf %51, %50 : vector<16x1xf32>
      %c0_30 = arith.constant 0 : index
      %c0_31 = arith.constant 0 : index
      %53 = vector.load %arg7[%c0_30, %c0_31] : memref<16x1xf32, #tpu.memory_space<vmem>>, vector<16x1xf32>
      %cst_32 = arith.constant 6.400000e+01 : f32
      %54 = vector.broadcast %cst_32 : f32 to vector<16x1xf32>
      %55 = arith.mulf %54, %35 : vector<16x1xf32>
      %56 = math.exp %55 : vector<16x1xf32>
      %57 = arith.subf %53, %56 : vector<16x1xf32>
      %58 = math.exp %52 : vector<16x1xf32>
      %59 = arith.addf %58, %57 : vector<16x1xf32>
      %60 = math.log %59 : vector<16x1xf32>
      %61 = arith.subf %52, %60 : vector<16x1xf32>
      %c16_i32 = arith.constant 16 : i32
      %62 = arith.muli %arg0, %c16_i32 : i32
      %63 = tpu.iota {dimensions = array<i32: 0>} : vector<16x1xi32>
      %64 = vector.broadcast %62 : i32 to vector<16x1xi32>
      %65 = arith.addi %64, %63 : vector<16x1xi32>
      %c16_i32_33 = arith.constant 16 : i32
      %66 = vector.broadcast %c16_i32_33 : i32 to vector<16x1xi32>
      %67 = arith.cmpi slt, %65, %66 : vector<16x1xi32>
      %cst_34 = arith.constant 0.000000e+00 : f32
      %68 = vector.broadcast %cst_34 : f32 to vector<16x1xf32>
      %69 = arith.select %67, %61, %68 : vector<16x1xi1>, vector<16x1xf32>
      %70 = vector.shape_cast %69 : vector<16x1xf32> to vector<1x16x1xf32>
      %cst_35 = arith.constant dense<0.000000e+00> : vector<1xf32>
      %71 = vector.multi_reduction <add>, %70, %cst_35 [1, 2] : vector<1x16x1xf32> to vector<1xf32>
      %72 = vector.shape_cast %71 : vector<1xf32> to vector<1x1x1xf32>
      %73 = vector.extract %72[0, 0, 0] : f32 from vector<1x1x1xf32>
      %74 = tpu.iota {dimensions = array<i32: 0>} : vector<8x128xi32>
      %75 = tpu.iota {dimensions = array<i32: 1>} : vector<8x128xi32>
      %c0_i32_36 = arith.constant 0 : i32
      %76 = vector.broadcast %c0_i32_36 : i32 to vector<8x128xi32>
      %77 = arith.cmpi eq, %74, %76 : vector<8x128xi32>
      %c0_i32_37 = arith.constant 0 : i32
      %78 = vector.broadcast %c0_i32_37 : i32 to vector<8x128xi32>
      %79 = arith.cmpi eq, %75, %78 : vector<8x128xi32>
      %80 = arith.andi %77, %79 : vector<8x128xi1>
      %cst_38 = arith.constant 0.000000e+00 : f32
      %81 = vector.broadcast %73 : f32 to vector<8x128xf32>
      %82 = vector.broadcast %cst_38 : f32 to vector<8x128xf32>
      %83 = arith.select %80, %81, %82 : vector<8x128xi1>, vector<8x128xf32>
      %c0_39 = arith.constant 0 : index
      %c0_40 = arith.constant 0 : index
      %84 = vector.load %arg5[%c0_39, %c0_40] : memref<8x128xf32, #tpu.memory_space<vmem>>, vector<8x128xf32>
      tpu.vector_store %arg5[%c0_39, %c0_40], %83 {strides = array<i32>} : memref<8x128xf32, #tpu.memory_space<vmem>>, vector<8x128xf32>,
    } else {
    }
    return
  }
  func.func @transform_0(%arg0: i32, %arg1: i32) -> (i32, i32) {
    %c0_i32 = arith.constant 0 : i32
    %c0_i32_0 = arith.constant 0 : i32
    return %arg0, %c0_i32 : i32, i32
  }
  func.func @transform_1(%arg0: i32, %arg1: i32) -> (i32, i32) {
    %c0_i32 = arith.constant 0 : i32
    %c0_i32_0 = arith.constant 0 : i32
    return %c0_i32, %arg1 : i32, i32
  }
  func.func @transform_2(%arg0: i32, %arg1: i32) -> (i32, i32) {
    %c0_i32 = arith.constant 0 : i32
    %c0_i32_0 = arith.constant 0 : i32
    return %arg0, %c0_i32 : i32, i32
  }
  func.func @transform_3(%arg0: i32, %arg1: i32) -> (i32, i32) {
    %c0_i32 = arith.constant 0 : i32
    %c0_i32_0 = arith.constant 0 : i32
    return %arg0, %c0_i32 : i32, i32
  }
}

</mosaic_0001>

<bundles_post_ra>
// kernel: tpu_custom_call.1
= control target key start
LH: loop header
LB: loop body
LE: loop exit
PB: predicated region body
PF: predicated region fallthrough
CT: control target
= control target key end

     0   :  { %8 = vsyncpa [#allocation6], 0  ;;  %s482_s0 = inlined_call_operand.vmem [shape: f32[16,64], index: 0, kind: input, shape index: {}]   ;;  %s483_s1 = inlined_call_operand.hbm [shape: bf16[64,128], index: 1, kind: input, shape index: {}]   ;;  %s484_s2 = inlined_call_operand.vmem [shape: s32[16,1], index: 2, kind: input, shape index: {}]   ;;  %s485_s3 = inlined_call_operand.hbm [shape: f32[8,128], index: 3, kind: output, shape index: {}]  }
   0x1   :  { %9 = vsyncpa [#allocation7], 0  ;;  %s397_s12 = smov [#allocation5]   ;;  %s349_s16 = scalar_lea.hbm %s483_s1, 512 }
   0x2   :  { %s17_s13 = sshll.u32 %s397_s12, 4  ;;  %p350_p0 = scmp.ne.s32.totalorder %s483_s1, %s349_s16  ;;  %s18_s13 = int_to_ptr.vmem [resolvable:$true] %s17_s13 }
   0x3   :  { %p353_p1 = scmp.lt.u32.totalorder %s349_s16, %s483_s1 }
   0x5   :  { %p355_p2 = pnand %p353_p1, %p350_p0 }
   0x7   :  { %358 = shalt.err (!%p355_p2)
}
   0x8   :  { %s359_s21 = scalar_lea.vmem %s18_s13, 512  ;;  %p364_p4 = scmp.lt.s32.totalorder %s18_s13, %s18_s13 }
   0x9   :  { %p360_p3 = scmp.ne.s32.totalorder %s18_s13, %s359_s21  ;;  %p365_p5 = scmp.lt.s32.totalorder %s359_s21, %s359_s21 }
   0xb   :  { %p366_p6 = por %p365_p5, %p364_p4 }
   0xd   :  { %p367_p7 = pnand %p366_p6, %p360_p3 }
   0xf   :  { %370 = shalt.err (!%p367_p7)
}
  0x10   :  { %s398_s22 = smov 64   ;;  %s399_s23 = smov 4  }
  0x11   :  { %23 = dma.hbm_to_vmem [thread:$0]  %s483_s1, 512, %s18_s13, [#allocation6], %s398_s22, %s398_s22, %s399_s23  }
  0x12   :  { %393 = dma.done.wait [#allocation6], 512  }
  0x13   :  { %394 = vsyncadd [#allocation6], 4294966784  ;;  %v34_v0 = vld [vmem:[%s482_s0] sm:$0xff]  ;;  %vm38_vm0 = vcmask 523264   ;;  %v35_v1 = vld [vmem:[%s482_s0 + $0x8] sm:$0xff]  ;;  %v400_v7 = vmov 0.0   ;;  %v139_v24 = vlaneseq }
  0x14   :  { %v36_v2 = vmul.f32 %v34_v0, %v34_v0  ;;  %v37_v3 = vmul.f32 %v35_v1, %v35_v1  ;;  %v321_v6 = vld [vmem:[#allocation5] sm:$0xff]   ;;  %298 = vmatprep.subr.bf16.mxu0 %v400_v7  ;;  %v322_v8 = vld [vmem:[#allocation5 + $0x8] sm:$0xff]   ;;  %v323_v9 = vld [vmem:[#allocation5 + $0x10] sm:$0xff]   ;;  %vm401_vm1 = vmmov 0   ;;  %v402_v12 = vmov 0  }
  0x15   :  { %299 = vmatpush3.bf16.msra.mxu0 %v321_v6  ;;  %v324_v10 = vld [vmem:[#allocation5 + $0x18] sm:$0xff]   ;;  %306 = vmatprep.mubr.msk.bf16.mxu0 %vm401_vm1, %v400_v7  ;;  %v137_v13 = vld [vmem:[%s484_s2 + $0x8] sm:$0xff]  ;;  %vm53_vm2 = vcmask 7168   ;;  %v457_v26 = vand.u32 127, %v139_v24 }
  0x16   :  { %v39_v4 = vsel %vm38_vm0, %v36_v2, 0.0  ;;  %v42_v5 = vsel %vm38_vm0, %v37_v3, 0.0  ;;  %300 = vmatprep.subr.bf16.mxu0 %v400_v7  ;;  %v136_v11 = vld [vmem:[%s484_s2] sm:$0xff]  ;;  %319 = vset.pattern.permute.xlu1 %v402_v12  ;;  %56 = vst.msk [vmem:[#allocation4] sm:$0xff] %vm53_vm2, %v400_v7  ;;  %54 = vst.msk [vmem:[#allocation3] sm:$0xff] %vm53_vm2, %v400_v7  ;;  %s403_s2 = smov [#allocation8]  }
  0x17   :  { %40 = vadd.xlane.f32.xlu0 %v39_v4  ;;  %144 = vperm.xlu1 %319, %v136_v11   ;;  %55 = vst.msk [vmem:[#allocation3 + $0x8] sm:$0xff] %vm53_vm2, %v400_v7  ;;  %57 = vst.msk [vmem:[#allocation4 + $0x8] sm:$0xff] %vm53_vm2, %v400_v7  ;;  %vm157_vm5 = vcmp.lt.s32.totalorder %v457_v26, 32  ;;  %vm266_vm11 = vcmp.eq.s32.totalorder %v457_v26, 0  ;;  %s277_s5 = sshll.u32 %s403_s2, 4  ;;  %s278_s5 = int_to_ptr.vmem [resolvable:$true] %s277_s5 }
  0x18   :  { %320 = vset.pattern.permute.xlu0 %v402_v12  ;;  %s371_s7 = scalar_lea.vmem %s278_s5, 128  ;;  %p376_p9 = scmp.lt.s32.totalorder %s278_s5, %s278_s5 }
  0x19   :  { %301 = vmatpush3.bf16.msra.mxu0 %v322_v8  ;;  %p372_p8 = scmp.ne.s32.totalorder %s278_s5, %s371_s7  ;;  %p377_p10 = scmp.lt.s32.totalorder %s371_s7, %s371_s7 }
  0x1a   :  { %302 = vmatprep.subr.bf16.mxu0 %v400_v7 }
  0x1b   :  { %43 = vadd.xlane.f32.xlu0 %v42_v5  ;;  %147 = vperm.xlu1 %319, %v137_v13   ;;  %p378_p11 = por %p377_p10, %p376_p9 }
  0x1d   :  { %303 = vmatpush3.bf16.msra.mxu0 %v323_v9  ;;  %v171_v42 = vld [vmem:[#allocation4] sm:$0xff]  ;;  %v160_v51 = vld [vmem:[#allocation3] sm:$0xff]  ;;  %p379_p12 = pnand %p378_p11, %p372_p8 }
  0x1e   :  { %304 = vmatprep.subr.bf16.mxu0 %v400_v7  ;;  %v172_v44 = vld [vmem:[#allocation4 + $0x8] sm:$0xff]  ;;  %v161_v58 = vld [vmem:[#allocation3 + $0x8] sm:$0xff] }
  0x21   :  { %305 = vmatpush3.bf16.msra.mxu0 %v324_v10 }
  0x96   :  { %v145_v25 = vpop.permute.xlu1 %144 }
  0x97   :  { %vm149_vm3 = vcmp.eq.s32.totalorder %v457_v26, %v145_v25 }
  0x9a   :  { %v148_v27 = vpop.permute.xlu1 %147 }
  0x9b   :  { %vm150_vm4 = vcmp.eq.s32.totalorder %v457_v26, %v148_v27 }
  0xa4   :  { %v41_v14 = vpop.xlane.xlu0 %40 }
  0xa5   :  { %v45_v15 = vmax.f32 %v41_v14, 1e-24 }
  0xa7   :  { %325 = vrsqrt.f32 %v45_v15 }
  0xa8   :  { %v44_v16 = vpop.xlane.xlu0 %43 }
  0xa9   :  { %v46_v17 = vmax.f32 %v44_v16, 1e-24 }
  0xab   :  { %327 = vrsqrt.f32 %v46_v17 }
  0xb1   :  { %v326_v18 = vpop.eup %325 }
  0xb2   :  { %v49_v20 = vmul.f32 %v326_v18, %v34_v0 }
  0xb5   :  { %v328_v19 = vpop.eup %327 }
  0xb6   :  { %v50_v21 = vmul.f32 %v328_v19, %v35_v1 }
  0xb8   :  { %v51_v22 = vpack.c.bf16 %v50_v21, %v49_v20 }
  0xba   :  { %52 = vst.msk [vmem:[#allocation2] sm:$0xff] %vm38_vm0, %v51_v22 }
  0xc1   :  { %v58_v23 = vld [vmem:[#allocation2] sm:$0xff] }
  0xc2   :  { %307 = vmatmul.mubr.msk.bf16.vlgmr.msra.gmra.mrb[0].mxu0 %vm38_vm0, %v58_v23 }
 0x195   :  { %v129_v28 = vpop.f32.mrb[0].mxu0 }
 0x196   :  { %v151_v29 = vmul.f32 64.0, %v129_v28  ;;  %v308_v30 = vpop.f32.mrb[1].mxu0  ;;  %v173_v31 = vsel %vm149_vm3, %v129_v28, 0.0 }
 0x197   :  { %175 = vadd.xlane.f32.xlu0 %v173_v31  ;;  %v132_v32 = vpop.f32.mrb[2].mxu0 }
 0x198   :  { %v153_v33 = vmul.f32 1.442695, %v151_v29  ;;  %v152_v34 = vmul.f32 64.0, %v132_v32  ;;  %v309_v35 = vpop.f32.mrb[3].mxu0  ;;  %v174_v36 = vsel %vm150_vm4, %v132_v32, 0.0 }
 0x199   :  { %177 = vadd.xlane.f32.xlu1 %v174_v36 }
 0x19a   :  { %329 = vpow2.f32 %v153_v33  ;;  %v155_v37 = vmul.f32 1.442695, %v152_v34 }
 0x19c   :  { %331 = vpow2.f32 %v155_v37 }
 0x1a4   :  { %v330_v38 = vpop.eup %329 }
 0x1a5   :  { %v158_v39 = vsel %vm157_vm5, %v330_v38, 0.0 }
 0x1a6   :  { %v332_v40 = vpop.eup %331  ;;  %162 = vadd.xlane.f32.xlu0 %v158_v39 }
 0x1a7   :  { %v159_v41 = vsel %vm157_vm5, %v332_v40, 0.0 }
 0x1aa   :  { %164 = vadd.xlane.f32.xlu0 %v159_v41 }
 0x224   :  { %v176_v43 = vpop.xlane.xlu0 %175 }
 0x225   :  { %v179_v45 = vadd.f32 %v176_v43, %v171_v42 }
 0x226   :  { %v178_v46 = vpop.xlane.xlu1 %177 }
 0x227   :  { %181 = vst.msk [vmem:[#allocation4] sm:$0xff] %vm53_vm2, %v179_v45  ;;  %v180_v47 = vadd.f32 %v178_v46, %v172_v44 }
 0x229   :  { %182 = vst.msk [vmem:[#allocation4 + $0x8] sm:$0xff] %vm53_vm2, %v180_v47 }
 0x22e   :  { %v186_v48 = vld [vmem:[#allocation4] sm:$0xff] }
 0x22f   :  { %v291_v49 = vclamps-f32 %v186_v48, 0.9999999  ;;  %v222_v2 = vmul.f32 64.0, %v186_v48 }
 0x230   :  { %v187_v50 = vld [vmem:[#allocation4 + $0x8] sm:$0xff] }
 0x231   :  { %v292_v52 = vclamps-f32 %v187_v50, 0.9999999  ;;  %v194_v53 = vmul.f32 %v291_v49, %v291_v49  ;;  %v192_v5 = vmul.f32 0.87758255, %v291_v49  ;;  %v223_v10 = vmul.f32 64.0, %v187_v50 }
 0x232   :  { %v224_v13 = vmul.f32 1.442695, %v222_v2 }
 0x233   :  { %v163_v54 = vpop.xlane.xlu0 %162  ;;  %v195_v55 = vmul.f32 %v292_v52, %v292_v52  ;;  %v196_v56 = vsub.f32 1.0, %v194_v53  ;;  %v193_v15 = vmul.f32 0.87758255, %v292_v52  ;;  %v226_v18 = vmul.f32 1.442695, %v223_v10 }
 0x234   :  { %v166_v57 = vadd.f32 %v163_v54, %v160_v51  ;;  %v244_v52 = vshrl.u32 %v139_v24, 7 }
 0x235   :  { %v197_v59 = vsub.f32 1.0, %v195_v55  ;;  %v198_v60 = vmax.f32 %v196_v56, 0.0 }
 0x236   :  { %169 = vst.msk [vmem:[#allocation3] sm:$0xff] %vm53_vm2, %v166_v57  ;;  %vm265_vm10 = vcmp.eq.s32.totalorder %v244_v52, 0 }
 0x237   :  { %v165_v61 = vpop.xlane.xlu0 %164  ;;  %v199_v62 = vmax.f32 %v197_v59, 0.0  ;;  %333 = vrsqrt.f32 %v198_v60  ;;  %vm202_vm6 = vcmp.eq.f32.partialorder %v198_v60, inf  ;;  %v205_v4 = vand.u32 2147483648, %v198_v60  ;;  %vm267_vm12 = vmand %vm265_vm10, %vm266_vm11 }
 0x238   :  { %v167_v63 = vadd.f32 %v165_v61, %v161_v58  ;;  %vm204_vm7 = vcmp.eq.f32.partialorder %v198_v60, 0.0 }
 0x239   :  { %335 = vrsqrt.f32 %v199_v62  ;;  %vm209_vm8 = vcmp.eq.f32.partialorder %v199_v62, inf  ;;  %v212_v9 = vand.u32 2147483648, %v199_v62  ;;  %vm211_vm9 = vcmp.eq.f32.partialorder %v199_v62, 0.0 }
 0x23a   :  { %170 = vst.msk [vmem:[#allocation3 + $0x8] sm:$0xff] %vm53_vm2, %v167_v63  ;;  %337 = vpow2.f32 %v224_v13 }
 0x23b   :  { %339 = vpow2.f32 %v226_v18 }
 0x23d   :  { %v220_v27 = vld [vmem:[#allocation3] sm:$0xff] }
 0x241   :  { %v334_v0 = vpop.eup %333  ;;  %v221_v28 = vld [vmem:[#allocation3 + $0x8] sm:$0xff] }
 0x242   :  { %v201_v1 = vmul.f32 %v334_v0, %v198_v60 }
 0x243   :  { %v336_v3 = vpop.eup %335 }
 0x244   :  { %v203_v6 = vsel %vm202_vm6, %v198_v60, %v201_v1  ;;  %v208_v7 = vmul.f32 %v336_v3, %v199_v62  ;;  %v338_v25 = vpop.eup %337 }
 0x245   :  { %v206_v8 = vsel %vm204_vm7, %v205_v4, %v203_v6  ;;  %v340_v29 = vpop.eup %339  ;;  %v228_v30 = vsub.f32 %v220_v27, %v338_v25 }
 0x246   :  { %v210_v11 = vsel %vm209_vm8, %v199_v62, %v208_v7  ;;  %v214_v12 = vmul.f32 0.47942555, %v206_v8  ;;  %v229_v32 = vsub.f32 %v221_v28, %v340_v29 }
 0x247   :  { %v213_v14 = vsel %vm211_vm9, %v212_v9, %v210_v11 }
 0x248   :  { %v215_v16 = vmul.f32 0.47942555, %v213_v14  ;;  %v216_v17 = vsub.f32 %v192_v5, %v214_v12 }
 0x24a   :  { %v217_v19 = vsub.f32 %v193_v15, %v215_v16  ;;  %v218_v20 = vmul.f32 64.0, %v216_v17 }
 0x24c   :  { %v219_v21 = vmul.f32 64.0, %v217_v19  ;;  %v230_v22 = vmul.f32 1.442695, %v218_v20 }
 0x24e   :  { %341 = vpow2.f32 %v230_v22  ;;  %v232_v23 = vmul.f32 1.442695, %v219_v21 }
 0x250   :  { %343 = vpow2.f32 %v232_v23 }
 0x258   :  { %v342_v31 = vpop.eup %341 }
 0x259   :  { %v234_v33 = vadd.f32 %v342_v31, %v228_v30 }
 0x25a   :  { %v344_v34 = vpop.eup %343 }
 0x25b   :  { %v235_v35 = vadd.f32 %v344_v34, %v229_v32  ;;  %345 = vlog2.f32 %v234_v33 }
 0x25d   :  { %347 = vlog2.f32 %v235_v35 }
 0x265   :  { %v346_v36 = vpop.eup %345 }
 0x266   :  { %v237_v37 = vmul.f32 0.6931472, %v346_v36 }
 0x267   :  { %v348_v38 = vpop.eup %347 }
 0x268   :  { %v239_v39 = vmul.f32 0.6931472, %v348_v38  ;;  %v240_v40 = vsub.f32 %v218_v20, %v237_v37 }
 0x26a   :  { %v241_v41 = vsub.f32 %v219_v21, %v239_v39  ;;  %v253_v42 = vsel %vm53_vm2, %v240_v40, 0.0 }
 0x26c   :  { %v254_v43 = vsel %vm53_vm2, %v241_v41, 0.0 }
 0x26d   :  { %v255_v44 = vadd.f32 %v254_v43, %v253_v42 }
 0x26f   :  { %256 = vadd.xlane.f32.xlu0 %v255_v44 }
 0x2fc   :  { %v257_v45 = vpop.xlane.xlu0 %256 }
 0x2fd   :  { %v258_v46 = vrot.slane %v257_v45, 4 }
 0x2ff   :  { %v259_v47 = vadd.f32 %v258_v46, %v257_v45 }
 0x301   :  { %v260_v48 = vrot.slane %v259_v47, 2 }
 0x303   :  { %v261_v49 = vadd.f32 %v260_v48, %v259_v47 }
 0x305   :  { %v262_v50 = vrot.slane %v261_v49, 1 }
 0x307   :  { %v263_v51 = vadd.f32 %v262_v50, %v261_v49 }
 0x309   :  { %310 = vpush %v263_v51 }
 0x33a   :  { %s311_s6 = spop %310 }
 0x33b   :  { %v268_v53 = vstv %s311_s6 }
 0x33c   :  { %v269_v54 = vsel %vm267_vm12, %v268_v53, 0.0 }
 0x33d   :  { %270 = vst [vmem:[#allocation8] sm:$0xff] %v269_v54 }
 0x33e   :  { %382 = shalt.err (!%p379_p12)
}
 0x33f   :  { %s383_s10 = scalar_lea.hbm %s485_s3, 128 }
 0x340   :  { %p384_p13 = scmp.ne.s32.totalorder %s485_s3, %s383_s10  ;;  %p387_p0 = scmp.lt.u32.totalorder %s383_s10, %s485_s3 }
 0x342   :  { %p389_p1 = pnand %p387_p0, %p384_p13 }
 0x344   :  { %392 = shalt.err (!%p389_p1)
}
 0x345   :  { %280 = dma.vmem_to_hbm [thread:$0]  %s278_s5, 128, %s485_s3, [#allocation7]  }
 0x346   :  { %395 = dma.done.wait [#allocation7], 128  }
 0x347   :  { %396 = vsyncadd [#allocation7], 4294967168 }
 0x348   :  { %284 = vsyncpa [#allocation6], 1 }
 0x349   :  { %285 = vsyncpa [#allocation7], 1 }

</bundles_post_ra>
